<compile_context>
chip_gen: v6e
topology: v6e:2x2x1
jax: 0.10.0
libtpu: 0.0.40
codegen_flags: <defaults>
</compile_context>

<pallas_src>
import functools
import math

import jax
import jax.numpy as jnp
from jax.experimental import pallas as pl
from jax.experimental.pallas import tpu as pltpu

HALO = 8  # >= 2 required by the two stacked k=3 convs; 8 keeps sublane slices aligned


def _silu(x):
    return x * jax.nn.sigmoid(x)


def resnet_block_kernel(x_ref, ss_ref,
                        w1_ref, b1_ref, g1_ref,
                        w2_ref, b2_ref, g2_ref,
                        wr_ref, br_ref,
                        out_ref):
    W, _cin = x_ref.shape               # W = L_TILE + 2*HALO
    Lt, Cout = out_ref.shape
    P = (W - Lt) // 2                    # == HALO
    l = pl.program_id(1)
    L_total = pl.num_programs(1) * Lt    # true sequence length (wrapper asserts divisibility)

    # Global row index of every local window row; rows outside [0, L) are sequence padding.
    row = jax.lax.broadcasted_iota(jnp.int32, (W, 1), 0)
    g = l * Lt - P + row
    interior = jnp.logical_and(g >= 0, g < L_total)

    def shift_up(v):    # result[r] = v[r-1]; row 0 is junk and never consumed
        return jnp.concatenate([v[:1], v[:-1]], axis=0)

    def shift_dn(v):    # result[r] = v[r+1]; row W-1 is junk and never consumed
        return jnp.concatenate([v[1:], v[-1:]], axis=0)

    def conv3(v_bf16, wcat_ref, b_ref):
        """k=3 conv as ONE im2col bf16 MXU matmul with f32 accumulation.

        v_bf16:   (W, C)        bf16 activations (zero-padding comes from the halo window)
        wcat_ref: (3*C, Cout)   bf16, taps stacked as [w_for(l-1); w_for(l); w_for(l+1)]
        """
        vcat = jnp.concatenate([shift_up(v_bf16), v_bf16, shift_dn(v_bf16)], axis=-1)
        return jnp.dot(vcat, wcat_ref[...], preferred_element_type=jnp.float32) + b_ref[...]

    def rmsnorm(h, gain_ref):
        # F.normalize(h, dim=channel) * g * sqrt(Cout); gain_ref already holds g*sqrt(Cout).
        # rsqrt(max(sumsq, eps^2)) == 1/max(||h||, eps) with eps=1e-12 (F.normalize semantics).
        inv = jax.lax.rsqrt(jnp.maximum(jnp.sum(h * h, axis=-1, keepdims=True), 1e-24))
        return h * inv * gain_ref[...]

    ss = ss_ref[...]                     # (1, 2*Cout) f32, computed once per row in the wrapper
    scale = ss[:, :Cout]
    shift = ss[:, Cout:]

    xb = x_ref[...]                      # (W, Cin) bf16 window incl. halo

    # ---- block1: conv3 -> RMSNorm -> (scale+1)*h + shift -> SiLU ----
    h = conv3(xb, w1_ref, b1_ref)
    h = rmsnorm(h, g1_ref)
    h = _silu(h * (scale + 1.0) + shift)
    # conv2's zero padding exists only at the true sequence ends, never at tile boundaries.
    h = jnp.where(interior, h, 0.0)

    # ---- block2: conv3 -> RMSNorm -> SiLU ----
    h2 = _silu(rmsnorm(conv3(h.astype(jnp.bfloat16), w2_ref, b2_ref), g2_ref))

    # ---- residual conv1d(k=1) on the Lt output rows ----
    res = jnp.dot(xb[P:P + Lt, :], wr_ref[...],
                  preferred_element_type=jnp.float32) + br_ref[...]

    out_ref[...] = (h2[P:P + Lt, :] + res).astype(out_ref.dtype)


def prepare_params(params):
    """One-time reshape / bf16 cast of weights into the kernel layout (not per forward)."""
    cout = params["g1"].shape[-1]
    return {
        "wm": params["wm"], "bm": params["bm"],                      # used by the hoisted MLP
        "w1c": params["w1"].reshape(-1, cout).astype(jnp.bfloat16),  # (3*Cin, Cout)
        "b1": params["b1"],
        "g1s": params["g1"] * math.sqrt(cout),                       # fold g * sqrt(Cout)
        "w2c": params["w2"].reshape(-1, cout).astype(jnp.bfloat16),  # (3*Cout, Cout)
        "b2": params["b2"],
        "g2s": params["g2"] * math.sqrt(cout),
        "wr": params["wr"].astype(jnp.bfloat16),                     # (Cin, Cout)
        "br": params["br"],
    }


@functools.partial(jax.jit, static_argnames=("l_tile",))
def resnet_block_forward(x_ncl, time_embed, kparams, *, l_tile=None):
    """x_ncl: (B, Cin, L) NCL like PyTorch; time_embed: (B, T). Returns (B, Cout, L)."""
    B, Cin, L = x_ncl.shape
    Cout = kparams["g1s"].shape[-1]
    P = HALO

    if l_tile is None:
        l_tile = min(L, 256)
    assert L % l_tile == 0 and l_tile % 8 == 0, (L, l_tile)   # keep l_tile a 16-multiple for bf16
    nL = L // l_tile
    W = l_tile + 2 * P

    # time-embed MLP hoisted out of the kernel: one batched XLA matmul, f32.
    ss = (_silu(time_embed) @ kparams["wm"] + kparams["bm"]).reshape(B, 1, 2 * Cout)

    # Layout glue (fused by XLA into one pass over x): NCL -> NLC, zero-pad +-HALO along L,
    # materialize the overlapping halo windows, cast to bf16 for the MXU.
    x_nlc = jnp.transpose(x_ncl, (0, 2, 1))
    xp = jnp.pad(x_nlc, ((0, 0), (P, P), (0, 0)))
    win = jnp.arange(nL)[:, None] * l_tile + jnp.arange(W)[None, :]
    x_win = xp[:, win, :].astype(jnp.bfloat16)                        # (B, nL, W, Cin)

    def const_spec(a):
        n = a.ndim
        # Block index never changes -> single-buffer to halve constant VMEM footprint.
        return pl.BlockSpec(a.shape, lambda b, l, _n=n: (0,) * _n,
                            pipeline_mode=pl.Buffered(buffer_count=1))

    weights = (kparams["w1c"], kparams["b1"], kparams["g1s"],
               kparams["w2c"], kparams["b2"], kparams["g2s"],
               kparams["wr"], kparams["br"])

    out = pl.pallas_call(
        resnet_block_kernel,
        grid=(B, nL),
        in_specs=[pl.BlockSpec((None, None, W, Cin), lambda b, l: (b, l, 0, 0)),
                  pl.BlockSpec((None, 1, 2 * Cout), lambda b, l: (b, 0, 0))]
                 + [const_spec(w) for w in weights],
        out_specs=pl.BlockSpec((None, l_tile, Cout), lambda b, l: (b, l, 0)),
        out_shape=jax.ShapeDtypeStruct((B, L, Cout), x_ncl.dtype),
        compiler_params=pltpu.CompilerParams(
            dimension_semantics=("parallel", "parallel"),
            # v5e/v6e (128 MiB VMEM): 64 MiB is comfortable.  On v7x (64 MiB physical) keep
            # this and shrink l_tile so the per-step working set stays under ~48 MiB.
            vmem_limit_bytes=64 * 1024 * 1024),
    )(x_win, ss, *weights)
    return jnp.transpose(out, (0, 2, 1))                              # back to (B, Cout, L)


def init_params(key, dim, dim_out, time_embed_dim):
    ks = jax.random.split(key, 8)
    p = {}
    p["wm"] = 0.1 * jax.random.normal(ks[0], (time_embed_dim, 2 * dim_out), jnp.float32)
    p["bm"] = 0.1 * jax.random.normal(ks[1], (1, 2 * dim_out), jnp.float32)
    p["w1"] = 0.2 * jax.random.normal(ks[2], (3, dim, dim_out), jnp.float32)
    p["b1"] = 0.1 * jax.random.normal(ks[3], (1, dim_out), jnp.float32)
    p["g1"] = jnp.ones((1, dim_out), jnp.float32)              # RMSNorm init = ones
    p["w2"] = 0.2 * jax.random.normal(ks[4], (3, dim_out, dim_out), jnp.float32)
    p["b2"] = 0.1 * jax.random.normal(ks[5], (1, dim_out), jnp.float32)
    p["g2"] = jnp.ones((1, dim_out), jnp.float32)
    p["wr"] = 0.2 * jax.random.normal(ks[6], (dim, dim_out), jnp.float32)
    p["br"] = 0.1 * jax.random.normal(ks[7], (1, dim_out), jnp.float32)
    return p


def ref_forward(x_ncl, te, p):
    """Pure-JAX f32 reference of the PyTorch forward, for validation."""
    B, Cin, L = x_ncl.shape
    Cout = p["g1"].shape[-1]
    x = jnp.transpose(x_ncl, (0, 2, 1))
    xp = jnp.pad(x, ((0, 0), (1, 1), (0, 0)))

    ss = jax.nn.silu(te) @ p["wm"] + p["bm"]
    scale, shift = ss[:, :Cout], ss[:, Cout:]

    def conv3(xpad, w, b):
        return sum(jnp.einsum("blc,co->blo", xpad[:, t:t + L, :], w[t])
                   for t in range(3)) + b

    def rms(h, g):
        den = jnp.maximum(jnp.linalg.norm(h, axis=-1, keepdims=True), 1e-12)
        return h / den * g * math.sqrt(Cout)

    h = conv3(xp, p["w1"], p["b1"])
    h = rms(h, p["g1"])
    h = h * (scale[:, None, :] + 1.0) + shift[:, None, :]
    h = jax.nn.silu(h)
    hp = jnp.pad(h, ((0, 0), (1, 1), (0, 0)))
    h2 = jax.nn.silu(rms(conv3(hp, p["w2"], p["b2"]), p["g2"]))
    res = jnp.einsum("blc,co->blo", x, p["wr"]) + p["br"]
    return jnp.transpose(h2 + res, (0, 2, 1))


if __name__ == "__main__":
    B, dim, dim_out, L, T = 2, 4, 8, 64, 32
    key = jax.random.PRNGKey(0)
    kx, kt, kp = jax.random.split(key, 3)

    x = jax.random.normal(kx, (B, dim, L), jnp.float32)        # NCL, like PyTorch Conv1d
    time_embed = jax.random.normal(kt, (B, T), jnp.float32)
    params = init_params(kp, dim, dim_out, T)
    kparams = prepare_params(params)

    # l_tile=32 -> 2 L-tiles per batch row, exercising the halo logic across a tile boundary.
    out = jax.block_until_ready(resnet_block_forward(x, time_embed, kparams, l_tile=32))
    ref = ref_forward(x, time_embed, params)

    assert out.shape == (B, dim_out, L), out.shape
    # bf16 MXU operands / bf16 weights vs a pure-f32 reference -> loose tolerance.
    err = float(jnp.max(jnp.abs(out - ref)))
    assert err < 1e-1, err

    print("KERNEL_OK")
</pallas_src>

<mosaic_0001>
module attributes {stable_mosaic.version = 11 : i64} {
  func.func @resnet_block_kernel(%arg0: i32, %arg1: i32, %arg2: memref<1x1x48x4xbf16, #tpu.memory_space<vmem>>, %arg3: memref<1x1x16xf32, #tpu.memory_space<vmem>>, %arg4: memref<12x8xbf16, #tpu.memory_space<vmem>>, %arg5: memref<1x8xf32, #tpu.memory_space<vmem>>, %arg6: memref<1x8xf32, #tpu.memory_space<vmem>>, %arg7: memref<24x8xbf16, #tpu.memory_space<vmem>>, %arg8: memref<1x8xf32, #tpu.memory_space<vmem>>, %arg9: memref<1x8xf32, #tpu.memory_space<vmem>>, %arg10: memref<4x8xbf16, #tpu.memory_space<vmem>>, %arg11: memref<1x8xf32, #tpu.memory_space<vmem>>, %arg12: memref<1x32x8xf32, #tpu.memory_space<vmem>>) attributes {dimension_semantics = [#tpu.dimension_semantics<parallel>, #tpu.dimension_semantics<parallel>], iteration_bounds = array<i64: 2, 2>, scalar_prefetch = 0 : i64, scratch_operands = 0 : i64, tpu.core_type = #tpu.core_type<tc>, window_params = [{transform_indices = @transform_0, window_bounds = array<i64: 1, 1, 48, 4>}, {transform_indices = @transform_1, window_bounds = array<i64: 1, 1, 16>}, {pipeline_mode = #tpu.pipeline_mode<synchronous>, transform_indices = @transform_2, window_bounds = array<i64: 12, 8>}, {pipeline_mode = #tpu.pipeline_mode<synchronous>, transform_indices = @transform_3, window_bounds = array<i64: 1, 8>}, {pipeline_mode = #tpu.pipeline_mode<synchronous>, transform_indices = @transform_4, window_bounds = array<i64: 1, 8>}, {pipeline_mode = #tpu.pipeline_mode<synchronous>, transform_indices = @transform_5, window_bounds = array<i64: 24, 8>}, {pipeline_mode = #tpu.pipeline_mode<synchronous>, transform_indices = @transform_6, window_bounds = array<i64: 1, 8>}, {pipeline_mode = #tpu.pipeline_mode<synchronous>, transform_indices = @transform_7, window_bounds = array<i64: 1, 8>}, {pipeline_mode = #tpu.pipeline_mode<synchronous>, transform_indices = @transform_8, window_bounds = array<i64: 4, 8>}, {pipeline_mode = #tpu.pipeline_mode<synchronous>, transform_indices = @transform_9, window_bounds = array<i64: 1, 8>}, {transform_indices = @transform_10, window_bounds = array<i64: 1, 32, 8>}]} {
    %0 = tpu.iota {dimensions = array<i32: 0>} : vector<48x1xi32>
    %c32_i32 = arith.constant 32 : i32
    %1 = arith.muli %arg1, %c32_i32 : i32
    %c8_i32 = arith.constant 8 : i32
    %2 = arith.subi %1, %c8_i32 : i32
    %3 = vector.broadcast %2 : i32 to vector<48x1xi32>
    %4 = arith.addi %3, %0 : vector<48x1xi32>
    %c0_i32 = arith.constant 0 : i32
    %5 = vector.broadcast %c0_i32 : i32 to vector<48x1xi32>
    %6 = arith.cmpi sge, %4, %5 : vector<48x1xi32>
    %c64_i32 = arith.constant 64 : i32
    %7 = vector.broadcast %c64_i32 : i32 to vector<48x1xi32>
    %8 = arith.cmpi slt, %4, %7 : vector<48x1xi32>
    %9 = arith.andi %6, %8 : vector<48x1xi1>
    %c0 = arith.constant 0 : index
    %c0_0 = arith.constant 0 : index
    %c0_1 = arith.constant 0 : index
    %10 = vector.load %arg3[%c0, %c0_0, %c0_1] : memref<1x1x16xf32, #tpu.memory_space<vmem>>, vector<1x1x16xf32>
    %11 = vector.shape_cast %10 : vector<1x1x16xf32> to vector<1x16xf32>
    %12 = vector.extract_strided_slice %11 {offsets = [0, 0], sizes = [1, 8], strides = [1, 1]} : vector<1x16xf32> to vector<1x8xf32>
    %13 = vector.extract_strided_slice %11 {offsets = [0, 8], sizes = [1, 8], strides = [1, 1]} : vector<1x16xf32> to vector<1x8xf32>
    %c0_2 = arith.constant 0 : index
    %c0_3 = arith.constant 0 : index
    %c0_4 = arith.constant 0 : index
    %c0_5 = arith.constant 0 : index
    %14 = vector.load %arg2[%c0_2, %c0_3, %c0_4, %c0_5] : memref<1x1x48x4xbf16, #tpu.memory_space<vmem>>, vector<1x1x48x4xbf16>
    %15 = vector.shape_cast %14 : vector<1x1x48x4xbf16> to vector<48x4xbf16>
    %16 = vector.extract_strided_slice %15 {offsets = [0, 0], sizes = [1, 4], strides = [1, 1]} : vector<48x4xbf16> to vector<1x4xbf16>
    %17 = vector.extract_strided_slice %15 {offsets = [0, 0], sizes = [47, 4], strides = [1, 1]} : vector<48x4xbf16> to vector<47x4xbf16>
    %18 = tpu.concatenate %16, %17 in 0 : vector<1x4xbf16>, vector<47x4xbf16> -> vector<48x4xbf16>
    %19 = vector.extract_strided_slice %15 {offsets = [1, 0], sizes = [47, 4], strides = [1, 1]} : vector<48x4xbf16> to vector<47x4xbf16>
    %20 = vector.extract_strided_slice %15 {offsets = [47, 0], sizes = [1, 4], strides = [1, 1]} : vector<48x4xbf16> to vector<1x4xbf16>
    %21 = tpu.concatenate %19, %20 in 0 : vector<47x4xbf16>, vector<1x4xbf16> -> vector<48x4xbf16>
    %22 = tpu.concatenate %18, %15, %21 in 1 : vector<48x4xbf16>, vector<48x4xbf16>, vector<48x4xbf16> -> vector<48x12xbf16>
    %c0_6 = arith.constant 0 : index
    %c0_7 = arith.constant 0 : index
    %23 = vector.load %arg4[%c0_6, %c0_7] : memref<12x8xbf16, #tpu.memory_space<vmem>>, vector<12x8xbf16>
    %cst = arith.constant dense<0.000000e+00> : vector<48x8xf32>
    %24 = tpu.matmul %22, %23, %cst {dimension_numbers = #tpu.dot_dimension_numbers<[1], [0], [0], [1], [0, 0, 1, 1], [], []>} : vector<48x12xbf16>, vector<12x8xbf16>, vector<48x8xf32> -> vector<48x8xf32>
    %c0_8 = arith.constant 0 : index
    %c0_9 = arith.constant 0 : index
    %25 = vector.load %arg5[%c0_8, %c0_9] : memref<1x8xf32, #tpu.memory_space<vmem>>, vector<1x8xf32>
    %26 = vector.broadcast %25 : vector<1x8xf32> to vector<48x8xf32>
    %27 = arith.addf %24, %26 : vector<48x8xf32>
    %28 = arith.mulf %27, %27 : vector<48x8xf32>
    %cst_10 = arith.constant dense<0.000000e+00> : vector<48xf32>
    %29 = vector.multi_reduction <add>, %28, %cst_10 [1] : vector<48x8xf32> to vector<48xf32>
    %30 = vector.shape_cast %29 : vector<48xf32> to vector<48x1xf32>
    %cst_11 = arith.constant 1.000000e-24 : f32
    %31 = vector.broadcast %cst_11 : f32 to vector<48x1xf32>
    %32 = arith.maximumf %30, %31 : vector<48x1xf32>
    %33 = math.rsqrt %32 : vector<48x1xf32>
    %34 = vector.broadcast %33 : vector<48x1xf32> to vector<48x8xf32>
    %35 = arith.mulf %27, %34 : vector<48x8xf32>
    %c0_12 = arith.constant 0 : index
    %c0_13 = arith.constant 0 : index
    %36 = vector.load %arg6[%c0_12, %c0_13] : memref<1x8xf32, #tpu.memory_space<vmem>>, vector<1x8xf32>
    %37 = vector.broadcast %36 : vector<1x8xf32> to vector<48x8xf32>
    %38 = arith.mulf %35, %37 : vector<48x8xf32>
    %cst_14 = arith.constant 1.000000e+00 : f32
    %39 = vector.broadcast %cst_14 : f32 to vector<1x8xf32>
    %40 = arith.addf %12, %39 : vector<1x8xf32>
    %41 = vector.broadcast %40 : vector<1x8xf32> to vector<48x8xf32>
    %42 = arith.mulf %38, %41 : vector<48x8xf32>
    %43 = vector.broadcast %13 : vector<1x8xf32> to vector<48x8xf32>
    %44 = arith.addf %42, %43 : vector<48x8xf32>
    %45 = arith.negf %44 : vector<48x8xf32>
    %46 = math.exp %45 : vector<48x8xf32>
    %cst_15 = arith.constant 1.000000e+00 : f32
    %47 = vector.broadcast %cst_15 : f32 to vector<48x8xf32>
    %48 = arith.addf %47, %46 : vector<48x8xf32>
    %49 = arith.divf %47, %48 : vector<48x8xf32>
    %50 = arith.mulf %44, %49 : vector<48x8xf32>
    %cst_16 = arith.constant 0.000000e+00 : f32
    %51 = vector.shape_cast %9 : vector<48x1xi1> to vector<48x1xi1>
    %52 = vector.broadcast %51 : vector<48x1xi1> to vector<48x8xi1>
    %53 = vector.broadcast %cst_16 : f32 to vector<48x8xf32>
    %54 = arith.select %52, %50, %53 : vector<48x8xi1>, vector<48x8xf32>
    %55 = arith.truncf %54 : vector<48x8xf32> to vector<48x8xbf16>
    %56 = vector.extract_strided_slice %55 {offsets = [0, 0], sizes = [1, 8], strides = [1, 1]} : vector<48x8xbf16> to vector<1x8xbf16>
    %57 = vector.extract_strided_slice %55 {offsets = [0, 0], sizes = [47, 8], strides = [1, 1]} : vector<48x8xbf16> to vector<47x8xbf16>
    %58 = tpu.concatenate %56, %57 in 0 : vector<1x8xbf16>, vector<47x8xbf16> -> vector<48x8xbf16>
    %59 = vector.extract_strided_slice %55 {offsets = [1, 0], sizes = [47, 8], strides = [1, 1]} : vector<48x8xbf16> to vector<47x8xbf16>
    %60 = vector.extract_strided_slice %55 {offsets = [47, 0], sizes = [1, 8], strides = [1, 1]} : vector<48x8xbf16> to vector<1x8xbf16>
    %61 = tpu.concatenate %59, %60 in 0 : vector<47x8xbf16>, vector<1x8xbf16> -> vector<48x8xbf16>
    %62 = tpu.concatenate %58, %55, %61 in 1 : vector<48x8xbf16>, vector<48x8xbf16>, vector<48x8xbf16> -> vector<48x24xbf16>
    %c0_17 = arith.constant 0 : index
    %c0_18 = arith.constant 0 : index
    %63 = vector.load %arg7[%c0_17, %c0_18] : memref<24x8xbf16, #tpu.memory_space<vmem>>, vector<24x8xbf16>
    %cst_19 = arith.constant dense<0.000000e+00> : vector<48x8xf32>
    %64 = tpu.matmul %62, %63, %cst_19 {dimension_numbers = #tpu.dot_dimension_numbers<[1], [0], [0], [1], [0, 0, 1, 1], [], []>} : vector<48x24xbf16>, vector<24x8xbf16>, vector<48x8xf32> -> vector<48x8xf32>
    %c0_20 = arith.constant 0 : index
    %c0_21 = arith.constant 0 : index
    %65 = vector.load %arg8[%c0_20, %c0_21] : memref<1x8xf32, #tpu.memory_space<vmem>>, vector<1x8xf32>
    %66 = vector.broadcast %65 : vector<1x8xf32> to vector<48x8xf32>
    %67 = arith.addf %64, %66 : vector<48x8xf32>
    %68 = arith.mulf %67, %67 : vector<48x8xf32>
    %cst_22 = arith.constant dense<0.000000e+00> : vector<48xf32>
    %69 = vector.multi_reduction <add>, %68, %cst_22 [1] : vector<48x8xf32> to vector<48xf32>
    %70 = vector.shape_cast %69 : vector<48xf32> to vector<48x1xf32>
    %cst_23 = arith.constant 1.000000e-24 : f32
    %71 = vector.broadcast %cst_23 : f32 to vector<48x1xf32>
    %72 = arith.maximumf %70, %71 : vector<48x1xf32>
    %73 = math.rsqrt %72 : vector<48x1xf32>
    %74 = vector.broadcast %73 : vector<48x1xf32> to vector<48x8xf32>
    %75 = arith.mulf %67, %74 : vector<48x8xf32>
    %c0_24 = arith.constant 0 : index
    %c0_25 = arith.constant 0 : index
    %76 = vector.load %arg9[%c0_24, %c0_25] : memref<1x8xf32, #tpu.memory_space<vmem>>, vector<1x8xf32>
    %77 = vector.broadcast %76 : vector<1x8xf32> to vector<48x8xf32>
    %78 = arith.mulf %75, %77 : vector<48x8xf32>
    %79 = arith.negf %78 : vector<48x8xf32>
    %80 = math.exp %79 : vector<48x8xf32>
    %cst_26 = arith.constant 1.000000e+00 : f32
    %81 = vector.broadcast %cst_26 : f32 to vector<48x8xf32>
    %82 = arith.addf %81, %80 : vector<48x8xf32>
    %83 = arith.divf %81, %82 : vector<48x8xf32>
    %84 = arith.mulf %78, %83 : vector<48x8xf32>
    %85 = vector.extract_strided_slice %15 {offsets = [8, 0], sizes = [32, 4], strides = [1, 1]} : vector<48x4xbf16> to vector<32x4xbf16>
    %c0_27 = arith.constant 0 : index
    %c0_28 = arith.constant 0 : index
    %86 = vector.load %arg10[%c0_27, %c0_28] : memref<4x8xbf16, #tpu.memory_space<vmem>>, vector<4x8xbf16>
    %cst_29 = arith.constant dense<0.000000e+00> : vector<32x8xf32>
    %87 = tpu.matmul %85, %86, %cst_29 {dimension_numbers = #tpu.dot_dimension_numbers<[1], [0], [0], [1], [0, 0, 1, 1], [], []>} : vector<32x4xbf16>, vector<4x8xbf16>, vector<32x8xf32> -> vector<32x8xf32>
    %c0_30 = arith.constant 0 : index
    %c0_31 = arith.constant 0 : index
    %88 = vector.load %arg11[%c0_30, %c0_31] : memref<1x8xf32, #tpu.memory_space<vmem>>, vector<1x8xf32>
    %89 = vector.broadcast %88 : vector<1x8xf32> to vector<32x8xf32>
    %90 = arith.addf %87, %89 : vector<32x8xf32>
    %91 = vector.extract_strided_slice %84 {offsets = [8, 0], sizes = [32, 8], strides = [1, 1]} : vector<48x8xf32> to vector<32x8xf32>
    %92 = arith.addf %91, %90 : vector<32x8xf32>
    %c0_32 = arith.constant 0 : index
    %c0_33 = arith.constant 0 : index
    %c0_34 = arith.constant 0 : index
    %93 = vector.load %arg12[%c0_32, %c0_33, %c0_34] : memref<1x32x8xf32, #tpu.memory_space<vmem>>, vector<1x32x8xf32>
    %94 = vector.shape_cast %93 : vector<1x32x8xf32> to vector<32x8xf32>
    %95 = vector.shape_cast %92 : vector<32x8xf32> to vector<1x32x8xf32>
    tpu.vector_store %arg12[%c0_32, %c0_33, %c0_34], %95 {strides = array<i32>} : memref<1x32x8xf32, #tpu.memory_space<vmem>>, vector<1x32x8xf32>,
    return
  }
  func.func @transform_0(%arg0: i32, %arg1: i32) -> (i32, i32, i32, i32) {
    %c0_i32 = arith.constant 0 : i32
    %c0_i32_0 = arith.constant 0 : i32
    %c0_i32_1 = arith.constant 0 : i32
    return %arg0, %arg1, %c0_i32, %c0_i32_0 : i32, i32, i32, i32
  }
  func.func @transform_1(%arg0: i32, %arg1: i32) -> (i32, i32, i32) {
    %c0_i32 = arith.constant 0 : i32
    %c0_i32_0 = arith.constant 0 : i32
    %c0_i32_1 = arith.constant 0 : i32
    return %arg0, %c0_i32, %c0_i32_0 : i32, i32, i32
  }
  func.func @transform_2(%arg0: i32, %arg1: i32) -> (i32, i32) {
    %c0_i32 = arith.constant 0 : i32
    %c0_i32_0 = arith.constant 0 : i32
    %c0_i32_1 = arith.constant 0 : i32
    return %c0_i32, %c0_i32_0 : i32, i32
  }
  func.func @transform_3(%arg0: i32, %arg1: i32) -> (i32, i32) {
    %c0_i32 = arith.constant 0 : i32
    %c0_i32_0 = arith.constant 0 : i32
    %c0_i32_1 = arith.constant 0 : i32
    return %c0_i32, %c0_i32_0 : i32, i32
  }
  func.func @transform_4(%arg0: i32, %arg1: i32) -> (i32, i32) {
    %c0_i32 = arith.constant 0 : i32
    %c0_i32_0 = arith.constant 0 : i32
    %c0_i32_1 = arith.constant 0 : i32
    return %c0_i32, %c0_i32_0 : i32, i32
  }
  func.func @transform_5(%arg0: i32, %arg1: i32) -> (i32, i32) {
    %c0_i32 = arith.constant 0 : i32
    %c0_i32_0 = arith.constant 0 : i32
    %c0_i32_1 = arith.constant 0 : i32
    return %c0_i32, %c0_i32_0 : i32, i32
  }
  func.func @transform_6(%arg0: i32, %arg1: i32) -> (i32, i32) {
    %c0_i32 = arith.constant 0 : i32
    %c0_i32_0 = arith.constant 0 : i32
    %c0_i32_1 = arith.constant 0 : i32
    return %c0_i32, %c0_i32_0 : i32, i32
  }
  func.func @transform_7(%arg0: i32, %arg1: i32) -> (i32, i32) {
    %c0_i32 = arith.constant 0 : i32
    %c0_i32_0 = arith.constant 0 : i32
    %c0_i32_1 = arith.constant 0 : i32
    return %c0_i32, %c0_i32_0 : i32, i32
  }
  func.func @transform_8(%arg0: i32, %arg1: i32) -> (i32, i32) {
    %c0_i32 = arith.constant 0 : i32
    %c0_i32_0 = arith.constant 0 : i32
    %c0_i32_1 = arith.constant 0 : i32
    return %c0_i32, %c0_i32_0 : i32, i32
  }
  func.func @transform_9(%arg0: i32, %arg1: i32) -> (i32, i32) {
    %c0_i32 = arith.constant 0 : i32
    %c0_i32_0 = arith.constant 0 : i32
    %c0_i32_1 = arith.constant 0 : i32
    return %c0_i32, %c0_i32_0 : i32, i32
  }
  func.func @transform_10(%arg0: i32, %arg1: i32) -> (i32, i32, i32) {
    %c0_i32 = arith.constant 0 : i32
    %c0_i32_0 = arith.constant 0 : i32
    return %arg0, %arg1, %c0_i32 : i32, i32, i32
  }
}

</mosaic_0001>

<bundles_post_ra>
// kernel: resnet_block_forward.1
= control target key start
LH: loop header
LB: loop body
LE: loop exit
PB: predicated region body
PF: predicated region fallthrough
CT: control target
= control target key end

     0   :  { %s1478_s13 = smov 0   ;;  %s1480_s14 = smov 0   ;;  %s1723_s0 = inlined_call_operand.vmem [shape: bf16[2,2,48,4], index: 0, kind: input, shape index: {}]   ;;  %s1724_s1 = inlined_call_operand.vmem [shape: f32[2,1,16], index: 1, kind: input, shape index: {}]   ;;  %s1725_s2 = inlined_call_operand.vmem [shape: bf16[12,8], index: 2, kind: input, shape index: {}]   ;;  %s1726_s3 = inlined_call_operand.vmem [shape: f32[1,8], index: 3, kind: input, shape index: {}]   ;;  %s1727_s4 = inlined_call_operand.vmem [shape: f32[1,8], index: 4, kind: input, shape index: {}]   ;;  %s1728_s5 = inlined_call_operand.vmem [shape: bf16[24,8], index: 5, kind: input, shape index: {}]   ;;  %s1729_s6 = inlined_call_operand.vmem [shape: f32[1,8], index: 6, kind: input, shape index: {}]   ;;  %s1730_s7 = inlined_call_operand.vmem [shape: f32[1,8], index: 7, kind: input, shape index: {}]   ;;  %s1731_s8 = inlined_call_operand.vmem [shape: bf16[4,8], index: 8, kind: input, shape index: {}]   ;;  %s1732_s9 = inlined_call_operand.vmem [shape: f32[1,8], index: 9, kind: input, shape index: {}]   ;;  %s1733_s10 = inlined_call_operand.vmem [shape: f32[2,64,8], index: 10, kind: output, shape index: {}]  }
   0x1   :  { %s1482_s15 = smov 0   ;;  %s1484_s16 = smov 0  }
   0x2   :  { %s1486_s17 = smov 0  }
   0x3 LB: > { %s29_s18 = sadd.s32 1, %s1407_s15  ;;  %s32_s19 = sadd.s32 1, %s1411_s16  ;;  %s1415_s17 = sphi %s1486_s17, %s20_s17   ;;  %s1411_s16 = sphi %s1484_s16, %s1741_s16   ;;  %s1407_s15 = sphi %s1482_s15, %s1740_s15   ;;  %s1403_s14 = sphi %s1480_s14, %s1739_s14   ;;  %s1399_s13 = sphi %s1478_s13, %s1738_s13  }
   0x4   : > { %p30_p0 = scmp.ge.s32.totalorder %s29_s18, 2  ;;  %p1170_p1 = scmp.ge.s32.totalorder %s1415_s17, 1 }
   0x5   : > { %p340_p2 = scmp.lt.s32.totalorder %s1415_s17, 5 }
   0x6   : > { %s1743_s18 = smov (%p30_p0, %s29_s18), 0  ;;  %s1745_s19 = smov (!%p30_p0, %s32_s19), %s1411_s16 }
   0x7   : > { %p341_p3 = pnand %p1170_p1, %p340_p2  ;;  %p34_p4 = scmp.ge.s32.totalorder %s1745_s19, 2 }
   0x8   : > { %p389_p5 = scmp.lt.s32.totalorder (!%p341_p3), %s1403_s14, 1  ;;  %p391_p6 = scmp.lt.s32.totalorder (!%p341_p3), %s1399_s13, 1 }
   0x9   : > { %s1747_s19 = smov (%p34_p4, %s1745_s19), 0  ;;  %344 = sbr.rel (%p341_p3) target bundleno = 1087 (0x43f), region = 60 }
   0xa   : > { %s1419_s30 = smov (!%p341_p3), 4   ;;  %s1420_s11 = smov (!%p341_p3), 8  }
   0xb   : > { %s1175_s27 = sshll.u32 (!%p341_p3), %s1399_s13, 5 }
   0xc   : > { %s1176_s28 = sadd.s32 (!%p341_p3), 4294967288, %s1175_s27  ;;  %s1172_s27 = sshll.u32 (!%p341_p3), %s1399_s13, 2 }
   0xd   : > { %p404_p7 = scmp.lt.s32.totalorder (!%p341_p3), %s1172_s27, 7 }
   0xe   : > { %s1749_s14 = smov (!%p389_p5, %s1403_s14), 1  ;;  %v1417_v0 = vmov 0.0   ;;  %vm562_vm0 = vcmask 1045504   ;;  %v1314_v1 = vld [vmem:[%s1725_s2] sm:$0x3f]   ;;  %vm1418_vm1 = vmmov 0   ;;  %v412_v53 = vlaneseq }
   0xf   : > { %1223 = vmatprep.subr.bf16.mxu0 %v1417_v0  ;;  %1237 = vmatprep.subr.bf16.mxu1 %v1417_v0  ;;  %s392_s20 = scalar_select %p391_p6, %s1399_s13, 1  ;;  %v564_v2 = vsel %vm562_vm0, %v1314_v1, 0  ;;  %vm468_vm2 = vsmask.f32 256  ;;  %vm493_vm3 = vcmask 1040384   ;;  %vm508_vm5 = vcmask 1047552  }
  0x10   : > { %s1261_s23 = smul.u32 12, %s1749_s14  ;;  %1224 = vmatpush3.bf16.msra.mxu0 %v564_v2  ;;  %1225 = vmatprep.mubr.msk.bf16.mxu0 %vm1418_vm1, %v1417_v0  ;;  %vm496_vm4 = vsmask.f32 7424  ;;  %vm1546_vm6 = vmand %vm493_vm3, %vm468_vm2  ;;  %vm524_vm8 = vcmask 31744   ;;  %vm534_vm9 = vcmask 64512   ;;  %vm555_vm10 = vcmask 97280   ;;  %s400_s21 = scalar_lea.vmem %s1724_s1, %s1749_s14 }
  0x11   : > { %s1260_s24 = smul.u32 6, %s392_s20  ;;  %1241 = vmatprep.mubr.msk.bf16.mxu1 %vm1418_vm1, %v1417_v0  ;;  %vm1552_vm7 = vmand %vm508_vm5, %vm496_vm4  ;;  %v446_v54 = vld [vmem:[%s400_s21] sm:$0x1]  ;;  %v1588_v55 = vshrl.u32 %v412_v53, 7  ;;  %vm861_vm11 = vcmask 1043456   ;;  %s1422_s21 = smov 16  }
  0x12   : > { %v678_v56 = vadd.f32 1.0, %v446_v54  ;;  %v1181_v59 = vld [vmem:[%s1726_s3] ss:$0 sm:$0xff]  ;;  %s1751_s27 = smov (!%p404_p7, %s1172_s27), 7 }
  0x13   : > { %s395_s25 = sadd.s32 %s1261_s23, %s1260_s24  ;;  %v682_v57 = vsub.s32 0, %v1588_v55  ;;  %s1421_s24 = smov 120  }
  0x14   : > { %s1171_s26 = sshll.u32 %s395_s25, 2 }
  0x15   : > { %s397_s29 = scalar_lea.vmem %s1723_s0, %s1171_s26  ;;  %v1591_v58 = vrot.slane %v678_v56, %v682_v57 }
  0x16   : > { %v447_v3 = vld [vmem:[%s397_s29] sm:$0xf]  ;;  %v1527_v4 = vld [vmem:[%s397_s29 + $0x4] sm:$0xf]  ;;  %v1529_v5 = vld [vmem:[%s397_s29 + $0x8] sm:$0xf] }
  0x17   : > { %v1531_v6 = vld [vmem:[%s397_s29 + $0xc] sm:$0xf]  ;;  %v1533_v7 = vld [vmem:[%s397_s29 + $0x10] sm:$0xf]  ;;  %v452_v8 = vld [vmem:[%s397_s29 + $0x14] sm:$0xf]  ;;  %v1177_v9 = vcombine.low %v447_v3, %v1527_v4  ;;  %v1205_v10 = vcombine.low %v1527_v4, %v1529_v5 }
  0x18   : > { %v1178_v11 = vcombine.low %v1529_v5, %v1531_v6  ;;  %v1179_v12 = vcombine.low %v1533_v7, %v452_v8  ;;  %v1206_v13 = vcombine.low %v1531_v6, %v1533_v7  ;;  %v1180_v28 = vcombine.low %v452_v8, %v452_v8 }
  0x19   : > { %511 = vrot.lane.b32.xlu0 %v1177_v9, %s1419_s30  ;;  %v473_v14 = vshll.u32 %v1177_v9, 16  ;;  %v470_v15 = vshrl.u32 %v1177_v9, 16 }
  0x1a   : > { %v480_v16 = vshll.u32 %v1178_v11, 16  ;;  %513 = vrot.lane.b32.xlu1 %v1178_v11, %s1419_s30  ;;  %v477_v17 = vshrl.u32 %v1178_v11, 16  ;;  %v488_v18 = vshll.u32 %v1179_v12, 16  ;;  %v485_v19 = vshrl.u32 %v1179_v12, 16 }
  0x1b   : > { %v497_v20 = vrot.slane %v473_v14, 1  ;;  %v472_v21 = vrot.slane %v470_v15, 7 }
  0x1c   : > { %v499_v22 = vrot.slane %v480_v16, 1  ;;  %v502_v23 = vrot.slane %v488_v18, 1  ;;  %v479_v24 = vrot.slane %v477_v17, 7  ;;  %v487_v25 = vrot.slane %v485_v19, 7 }
  0x1d   : > { %v498_v27 = vor.u32 %v497_v20, %v470_v15  ;;  %v475_v29 = vor.u32 %v473_v14, %v472_v21 }
  0x1e   : > { %v501_v30 = vor.u32 %v499_v22, %v477_v17  ;;  %v504_v31 = vor.u32 %v502_v23, %v485_v19  ;;  %v482_v32 = vor.u32 %v480_v16, %v479_v24  ;;  %v490_v33 = vor.u32 %v488_v18, %v487_v25 }
  0x1f   : > { %v500_v34 = vsel %vm496_vm4, %v498_v27, %v499_v22  ;;  %v495_v36 = vsel %vm1546_vm6, %v447_v3, %v475_v29 }
  0x20   : > { %518 = vrot.lane.b32.xlu0 %v500_v34, %s1420_s11  ;;  %v503_v37 = vsel %vm496_vm4, %v501_v30, %v502_v23  ;;  %v483_v38 = vsel %vm468_vm2, %v472_v21, %v482_v32  ;;  %v491_v39 = vsel %vm468_vm2, %v479_v24, %v490_v33  ;;  %v510_v40 = vsel %vm1552_vm7, %v504_v31, %v1180_v28 }
  0x21   : > { %520 = vrot.lane.b32.xlu1 %v503_v37, %s1420_s11  ;;  %v695_v31 = vrot.slane %v446_v54, %v682_v57 }
  0x24   : > { %515 = vrot.lane.b32.xlu0 %v1179_v12, %s1419_s30 }
  0x25   : > { %522 = vrot.lane.b32.xlu1 %v510_v40, %s1420_s11 }
  0x8b   : > { %v512_v41 = vpop.permute.xlu0 %511 }
  0x8c   : > { %v527_v42 = vsel %vm524_vm8, %v495_v36, %v512_v41  ;;  %v514_v44 = vpop.permute.xlu1 %513 }
  0x8d   : > { %v530_v46 = vsel %vm524_vm8, %v483_v38, %v514_v44 }
  0x92   : > { %v519_v43 = vpop.permute.xlu0 %518 }
  0x93   : > { %v536_v45 = vsel %vm534_vm9, %v527_v42, %v519_v43  ;;  %v521_v47 = vpop.permute.xlu1 %520  ;;  %v1186_v43 = vld [vmem:[%s1727_s4] ss:$0 sm:$0xff] }
  0x94   : > { %1226 = vmatmul.mubr.msk.bf16.vlgmr.msra.gmra.mxu0 %vm555_vm10, %v536_v45  ;;  %v538_v48 = vsel %vm534_vm9, %v530_v46, %v521_v47 }
  0x95   : > { %1229 = vmatprep.mubr.msk.bf16.mxu0 %vm1418_vm1, %v1417_v0 }
  0x96   : > { %v516_v49 = vpop.permute.xlu0 %515 }
  0x97   : > { %v533_v50 = vsel %vm524_vm8, %v491_v39, %v516_v49  ;;  %v523_v51 = vpop.permute.xlu1 %522 }
  0x98   : > { %v540_v52 = vsel %vm534_vm9, %v533_v50, %v523_v51 }
  0x9c   : > { %1230 = vmatmul.mubr.msk.bf16.gmra.mxu0 %vm555_vm10, %v538_v48 }
  0x9d   : > { %1233 = vmatprep.mubr.msk.bf16.mxu0 %vm1418_vm1, %v1417_v0 }
  0xa4   : > { %1234 = vmatmul.mubr.msk.bf16.gmra.mxu0 %vm555_vm10, %v540_v52 }
  0xa5   : > { %1255 = vmatprep.mubr.msk.bf16.mxu0 %vm524_vm8, %v1205_v10 }
 0x154   : > { %v600_v60 = vpop.f32.mrf.mxu0 }
 0x155   : > { %v601_v61 = vadd.f32 %v1181_v59, %v600_v60 }
 0x156   : > { %v1227_v62 = vpop.f32.mrf.mxu0 }
 0x157   : > { %v623_v63 = vmul.f32 %v601_v61, %v601_v61 }
 0x158   : > { %v603_v1 = vpop.f32.mrf.mxu0 }
 0x159   : > { %v604_v2 = vadd.f32 %v1181_v59, %v603_v1  ;;  %v629_v3 = vsel %vm534_vm9, %v623_v63, 0.0 }
 0x15a   : > { %630 = vadd.xlane.f32.xlu0 %v629_v3  ;;  %v1228_v4 = vpop.f32.mrf.mxu0 }
 0x15b   : > { %v624_v5 = vmul.f32 %v604_v2, %v604_v2 }
 0x15c   : > { %v608_v8 = vpop.f32.mrf.mxu0 }
 0x15d   : > { %v609_v9 = vadd.f32 %v1181_v59, %v608_v8  ;;  %v632_v10 = vsel %vm534_vm9, %v624_v5, 0.0 }
 0x15e   : > { %633 = vadd.xlane.f32.xlu1 %v632_v10  ;;  %v1231_v11 = vpop.f32.mrf.mxu0 }
 0x15f   : > { %v625_v12 = vmul.f32 %v609_v9, %v609_v9 }
 0x160   : > { %v611_v14 = vpop.f32.mrf.mxu0 }
 0x161   : > { %v612_v15 = vadd.f32 %v1181_v59, %v611_v14  ;;  %v635_v16 = vsel %vm534_vm9, %v625_v12, 0.0 }
 0x162   : > { %636 = vadd.xlane.f32.xlu0 %v635_v16  ;;  %v1232_v17 = vpop.f32.mrf.mxu0 }
 0x163   : > { %v626_v18 = vmul.f32 %v612_v15, %v612_v15 }
 0x164   : > { %v616_v19 = vpop.f32.mrf.mxu0 }
 0x165   : > { %v617_v20 = vadd.f32 %v1181_v59, %v616_v19  ;;  %v638_v21 = vsel %vm534_vm9, %v626_v18, 0.0 }
 0x166   : > { %639 = vadd.xlane.f32.xlu0 %v638_v21  ;;  %v1235_v22 = vpop.f32.mrf.mxu0 }
 0x167   : > { %v627_v23 = vmul.f32 %v617_v20, %v617_v20 }
 0x168   : > { %v619_v24 = vpop.f32.mrf.mxu0 }
 0x169   : > { %v620_v25 = vadd.f32 %v1181_v59, %v619_v24  ;;  %v641_v27 = vsel %vm534_vm9, %v627_v23, 0.0 }
 0x16a   : > { %642 = vadd.xlane.f32.xlu1 %v641_v27  ;;  %v1236_v28 = vpop.f32.mrf.mxu0 }
 0x16b   : > { %v628_v29 = vmul.f32 %v620_v25, %v620_v25 }
 0x16d   : > { %v644_v30 = vsel %vm534_vm9, %v628_v29, 0.0 }
 0x16e   : > { %645 = vadd.xlane.f32.xlu0 %v644_v30 }
 0x17b   : > { %696 = vrot.lane.b32.xlu1 %v695_v31, %s1421_s24 }
 0x1e3   : > { %v631_v32 = vpop.xlane.xlu0 %630 }
 0x1e4   : > { %v647_v33 = vmax.f32 %v631_v32, 1e-24  ;;  %v414_v32 = vadd.s32 8, %v1588_v55 }
 0x1e6   : > { %1317 = vrsqrt.f32 %v647_v33 }
 0x1e7   : > { %v634_v34 = vpop.xlane.xlu1 %633 }
 0x1e8   : > { %v648_v36 = vmax.f32 %v634_v34, 1e-24 }
 0x1ea   : > { %1319 = vrsqrt.f32 %v648_v36 }
 0x1eb   : > { %v637_v37 = vpop.xlane.xlu0 %636 }
 0x1ec   : > { %v649_v38 = vmax.f32 %v637_v37, 1e-24 }
 0x1ee   : > { %1321 = vrsqrt.f32 %v649_v38  ;;  %v1315_v38 = vld [vmem:[%s1728_s5 + $0x8] ss:$0 sps:$4 sm:$0xff]  }
 0x1ef   : > { %v640_v39 = vpop.xlane.xlu0 %639 }
 0x1f0   : > { %v650_v40 = vmax.f32 %v640_v39, 1e-24  ;;  %v415_v39 = vadd.s32 16, %v1588_v55 }
 0x1f2   : > { %1323 = vrsqrt.f32 %v650_v40 }
 0x1f3   : > { %v1318_v41 = vpop.eup %1317  ;;  %v643_v42 = vpop.xlane.xlu1 %642 }
 0x1f4   : > { %v659_v44 = vmul.f32 %v1318_v41, %v601_v61  ;;  %v651_v45 = vmax.f32 %v643_v42, 1e-24  ;;  %v863_v41 = vsel %vm861_vm11, %v1315_v38, 0 }
 0x1f5   : > { %1238 = vmatpush3.bf16.msra.mxu1 %v863_v41 }
 0x1f6   : > { %1325 = vrsqrt.f32 %v651_v45  ;;  %v672_v46 = vmul.f32 %v1186_v43, %v659_v44  ;;  %v416_v44 = vadd.s32 24, %v1588_v55  ;;  %v1316_v45 = vld [vmem:[%s1728_s5] sm:$0xff]   ;;  %1239 = vmatprep.subr.bf16.mxu1 %v1417_v0 }
 0x1f7   : > { %v1320_v47 = vpop.eup %1319  ;;  %v646_v48 = vpop.xlane.xlu0 %645 }
 0x1f8   : > { %v697_v49 = vpop.permute.xlu1 %696  ;;  %v660_v50 = vmul.f32 %v1320_v47, %v604_v2  ;;  %v652_v51 = vmax.f32 %v646_v48, 1e-24  ;;  %v685_v52 = vmul.f32 %v1591_v58, %v672_v46 }
 0x1f9   : > { %1240 = vmatpush3.bf16.msra.mxu1 %v1316_v45 }
 0x1fa   : > { %1327 = vrsqrt.f32 %v652_v51  ;;  %v673_v53 = vmul.f32 %v1186_v43, %v660_v50  ;;  %v1606_v54 = vadd.f32 %v697_v49, %v685_v52 }
 0x1fb   : > { %v1322_v56 = vpop.eup %1321 }
 0x1fc   : > { %v661_v57 = vmul.f32 %v1322_v56, %v609_v9  ;;  %v686_v59 = vmul.f32 %v1591_v58, %v673_v53  ;;  %v1187_v60 = vmul.f32 -1.442695, %v1606_v54 }
 0x1fe   : > { %v674_v61 = vmul.f32 %v1186_v43, %v661_v57  ;;  %v1610_v62 = vadd.f32 %v697_v49, %v686_v59  ;;  %1329 = vpow2.f32 %v1187_v60  ;;  %v417_v59 = vadd.s32 32, %v1588_v55 }
 0x1ff   : > { %v1324_v63 = vpop.eup %1323 }
 0x200   : > { %v662_v1 = vmul.f32 %v1324_v63, %v612_v15  ;;  %v687_v2 = vmul.f32 %v1591_v58, %v674_v61  ;;  %v1188_v3 = vmul.f32 -1.442695, %v1610_v62 }
 0x202   : > { %v675_v4 = vmul.f32 %v1186_v43, %v662_v1  ;;  %v1614_v5 = vadd.f32 %v697_v49, %v687_v2  ;;  %1331 = vpow2.f32 %v1188_v3 }
 0x203   : > { %v1326_v8 = vpop.eup %1325 }
 0x204   : > { %v663_v9 = vmul.f32 %v1326_v8, %v617_v20  ;;  %v688_v10 = vmul.f32 %v1591_v58, %v675_v4  ;;  %v1189_v11 = vmul.f32 -1.442695, %v1614_v5 }
 0x206   : > { %v676_v12 = vmul.f32 %v1186_v43, %v663_v9  ;;  %v1618_v14 = vadd.f32 %v697_v49, %v688_v10  ;;  %1333 = vpow2.f32 %v1189_v11 }
 0x207   : > { %v1328_v15 = vpop.eup %1327 }
 0x208   : > { %v664_v16 = vmul.f32 %v1328_v15, %v620_v25  ;;  %v689_v17 = vmul.f32 %v1591_v58, %v676_v12  ;;  %v1190_v18 = vmul.f32 -1.442695, %v1618_v14 }
 0x20a   : > { %v677_v19 = vmul.f32 %v1186_v43, %v664_v16  ;;  %v1622_v21 = vadd.f32 %v697_v49, %v689_v17  ;;  %1335 = vpow2.f32 %v1190_v18 }
 0x20b   : > { %v1330_v20 = vpop.eup %1329 }
 0x20c   : > { %v690_v22 = vmul.f32 %v1591_v58, %v677_v19  ;;  %v1191_v23 = vmul.f32 -1.442695, %v1622_v21  ;;  %v723_v24 = vadd.f32 1.0, %v1330_v20  ;;  %v421_v58 = vstv %s1176_s28  ;;  %s1173_s28 = sshll.u32 %s1749_s14, 3 }
 0x20d   : > { %v422_v36 = vadd.s32 %v421_v58, %v1588_v55  ;;  %v423_v37 = vadd.s32 %v421_v58, %v414_v32  ;;  %v424_v46 = vadd.s32 %v421_v58, %v415_v39  ;;  %v425_v51 = vadd.s32 %v421_v58, %v416_v44  ;;  %s407_s29 = sadd.s32 %s1173_s28, %s1751_s27 }
 0x20e   : > { %v1626_v27 = vadd.f32 %v697_v49, %v690_v22  ;;  %1337 = vpow2.f32 %v1191_v23  ;;  %v426_v2 = vadd.s32 %v421_v58, %v417_v59  ;;  %s1174_s13 = sshll.u32 %s407_s29, 3 }
 0x20f   : > { %v1332_v28 = vpop.eup %1331  ;;  %1339 = vrcp.f32 %v723_v24  ;;  %vm428_vm12 = vcmp.ge.s32.totalorder %v422_v36, 0  ;;  %vm434_vm13 = vcmp.lt.s32.totalorder %v422_v36, 64  ;;  %vm429_vm14 = vcmp.ge.s32.totalorder %v423_v37, 0  ;;  %s409_s14 = scalar_lea.vmem %s1733_s10, %s1174_s13 }
 0x210   : > { %v1192_v25 = vmul.f32 -1.442695, %v1626_v27  ;;  %v724_v29 = vadd.f32 1.0, %v1332_v28  ;;  %vm435_vm15 = vcmp.lt.s32.totalorder %v423_v37, 64  ;;  %vm440_vm0 = vmand %vm428_vm12, %vm434_vm13  ;;  %vm430_vm5 = vcmp.ge.s32.totalorder %v424_v46, 0 }
 0x211   : > { %vm441_vm3 = vmand %vm429_vm14, %vm435_vm15  ;;  %vm436_vm10 = vcmp.lt.s32.totalorder %v424_v46, 64  ;;  %vm431_vm11 = vcmp.ge.s32.totalorder %v425_v51, 0  ;;  %vm437_vm12 = vcmp.lt.s32.totalorder %v425_v51, 64  ;;  %vm432_vm15 = vcmp.ge.s32.totalorder %v426_v2, 0  ;;  %v1193_v51 = vld [vmem:[%s1729_s6] ss:$0 sm:$0xff] }
 0x212   : > { %1341 = vpow2.f32 %v1192_v25  ;;  %vm442_vm13 = vmand %vm430_vm5, %vm436_vm10 }
 0x213   : > { %v1334_v30 = vpop.eup %1333  ;;  %1343 = vrcp.f32 %v724_v29  ;;  %vm443_vm14 = vmand %vm431_vm11, %vm437_vm12  ;;  %vm828_vm12 = vcmask 130048  }
 0x214   : > { %v725_v31 = vadd.f32 1.0, %v1334_v30 }
 0x216   : > { %1345 = vrcp.f32 %v725_v31 }
 0x217   : > { %v1336_v33 = vpop.eup %1335 }
 0x218   : > { %v726_v34 = vadd.f32 1.0, %v1336_v33 }
 0x21a   : > { %1347 = vrcp.f32 %v726_v34 }
 0x21b   : > { %v1338_v40 = vpop.eup %1337 }
 0x21c   : > { %v1340_v42 = vpop.eup %1339  ;;  %v727_v43 = vadd.f32 1.0, %v1338_v40 }
 0x21d   : > { %v741_v48 = vmul.f32 %v1340_v42, %v1606_v54  ;;  %v418_v54 = vadd.s32 40, %v1588_v55 }
 0x21e   : > { %1349 = vrcp.f32 %v727_v43 }
 0x21f   : > { %v1342_v47 = vpop.eup %1341  ;;  %v759_v56 = vsel %vm440_vm0, %v741_v48, 0.0  ;;  %v427_v8 = vadd.s32 %v421_v58, %v418_v54  ;;  %vm438_vm0 = vcmp.lt.s32.totalorder %v426_v2, 64 }
 0x220   : > { %v1344_v49 = vpop.eup %1343  ;;  %v728_v50 = vadd.f32 1.0, %v1342_v47  ;;  %vm444_vm10 = vmand %vm432_vm15, %vm438_vm0 }
 0x221   : > { %v742_v52 = vmul.f32 %v1344_v49, %v1610_v62  ;;  %vm439_vm5 = vcmp.lt.s32.totalorder %v427_v8, 64 }
 0x222   : > { %1351 = vrcp.f32 %v728_v50 }
 0x223   : > { %v1346_v53 = vpop.eup %1345  ;;  %v760_v57 = vsel %vm441_vm3, %v742_v52, 0.0  ;;  %vm433_vm3 = vcmp.ge.s32.totalorder %v427_v8, 0 }
 0x224   : > { %v1644_v60 = vpack.c.bf16 %v760_v57, %v759_v56  ;;  %v743_v61 = vmul.f32 %v1346_v53, %v1614_v5  ;;  %vm445_vm11 = vmand %vm433_vm3, %vm439_vm5 }
 0x226   : > { %806 = vrot.lane.b32.xlu0 %v1644_v60, %s1420_s11  ;;  %v769_v62 = vshrl.u32 %v1644_v60, 16  ;;  %v772_v1 = vshll.u32 %v1644_v60, 16  ;;  %v761_v9 = vsel %vm442_vm13, %v743_v61, 0.0  ;;  %vm854_vm13 = vcmask 195584  }
 0x227   : > { %v1348_v63 = vpop.eup %1347 }
 0x228   : > { %v744_v3 = vmul.f32 %v1348_v63, %v1618_v14  ;;  %v771_v4 = vrot.slane %v769_v62, 7  ;;  %v793_v12 = vrot.slane %v772_v1, 1 }
 0x22a   : > { %v762_v10 = vsel %vm443_vm14, %v744_v3, 0.0  ;;  %v774_v55 = vor.u32 %v772_v1, %v771_v4  ;;  %v794_v19 = vor.u32 %v793_v12, %v769_v62 }
 0x22b   : > { %v1350_v11 = vpop.eup %1349  ;;  %v766_v5 = vpack.c.bf16 %v762_v10, %v761_v9 }
 0x22c   : > { %v792_v15 = vsel %vm1546_vm6, %v1644_v60, %v774_v55  ;;  %v745_v14 = vmul.f32 %v1350_v11, %v1622_v21  ;;  %v987_v21 = vld [vmem:[%s1731_s8] sm:$0x3]  ;;  %vm1003_vm6 = vcmask 1041408  }
 0x22d   : > { %v779_v16 = vshll.u32 %v766_v5, 16  ;;  %v776_v17 = vshrl.u32 %v766_v5, 16  ;;  %1259 = vmatprep.subr.msk.bf16.mxu0 %vm1003_vm6, %v987_v21  ;;  %v1005_v34 = vsel %vm1003_vm6, %v987_v21, 0 }
 0x22e   : > { %v763_v25 = vsel %vm444_vm10, %v745_v14, 0.0  ;;  %1254 = vmatpush3.bf16.msra.mxu0 %v1005_v34 }
 0x22f   : > { %v1352_v18 = vpop.eup %1351  ;;  %v795_v20 = vrot.slane %v779_v16, 1  ;;  %v778_v22 = vrot.slane %v776_v17, 7 }
 0x230   : > { %v746_v23 = vmul.f32 %v1352_v18, %v1626_v27 }
 0x231   : > { %v796_v24 = vsel %vm496_vm4, %v794_v19, %v795_v20  ;;  %v781_v28 = vor.u32 %v779_v16, %v778_v22  ;;  %v797_v27 = vor.u32 %v795_v20, %v776_v17  ;;  %1256 = vmatmul.mubr.msk.bf16.vlgmr.msra.gmra.mxu0 %vm524_vm8, %v1206_v13 }
 0x232   : > { %813 = vrot.lane.b32.xlu1 %v796_v24, %s1422_s21  ;;  %v764_v26 = vsel %vm445_vm11, %v746_v23, 0.0  ;;  %v1199_v24 = vld [vmem:[%s1730_s7] ss:$0 sm:$0xff] }
 0x233   : > { %v767_v29 = vpack.c.bf16 %v764_v26, %v763_v25  ;;  %v782_v30 = vsel %vm468_vm2, %v771_v4, %v781_v28 }
 0x235   : > { %v787_v31 = vshll.u32 %v767_v29, 16  ;;  %v784_v32 = vshrl.u32 %v767_v29, 16 }
 0x236   : > { %808 = vrot.lane.b32.xlu1 %v766_v5, %s1420_s11 }
 0x237   : > { %v798_v58 = vrot.slane %v787_v31, 1  ;;  %v786_v33 = vrot.slane %v784_v32, 7 }
 0x239   : > { %v799_v36 = vsel %vm496_vm4, %v797_v27, %v798_v58  ;;  %v800_v37 = vor.u32 %v798_v58, %v784_v32  ;;  %v789_v38 = vor.u32 %v787_v31, %v786_v33 }
 0x23a   : > { %810 = vrot.lane.b32.xlu1 %v767_v29, %s1420_s11  ;;  %815 = vrot.lane.b32.xlu0 %v799_v36, %s1422_s21 }
 0x23b   : > { %v790_v39 = vsel %vm468_vm2, %v778_v22, %v789_v38  ;;  %v802_v40 = vsel %vm1552_vm7, %v800_v37, %v767_v29 }
 0x23e   : > { %817 = vrot.lane.b32.xlu0 %v802_v40, %s1422_s21 }
 0x298   : > { %v807_v41 = vpop.permute.xlu0 %806 }
 0x299   : > { %v821_v42 = vsel %vm534_vm9, %v792_v15, %v807_v41 }
 0x2a4   : > { %v814_v43 = vpop.permute.xlu1 %813 }
 0x2a5   : > { %v830_v44 = vsel %vm828_vm12, %v821_v42, %v814_v43 }
 0x2a6   : > { %1242 = vmatmul.mubr.msk.bf16.vlgmr.msra.gmra.mxu1 %vm854_vm13, %v830_v44 }
 0x2a7   : > { %1245 = vmatprep.mubr.msk.bf16.mxu1 %vm1418_vm1, %v1417_v0 }
 0x2a8   : > { %v809_v6 = vpop.permute.xlu1 %808 }
 0x2a9   : > { %v824_v7 = vsel %vm534_vm9, %v782_v30, %v809_v6 }
 0x2ac   : > { %v816_v13 = vpop.permute.xlu0 %815  ;;  %v811_v45 = vpop.permute.xlu1 %810 }
 0x2ad   : > { %v832_v35 = vsel %vm828_vm12, %v824_v7, %v816_v13  ;;  %v827_v47 = vsel %vm534_vm9, %v790_v39, %v811_v45 }
 0x2ae   : > { %1246 = vmatmul.mubr.msk.bf16.gmra.mxu1 %vm854_vm13, %v832_v35  ;;  %v1204_v35 = vld [vmem:[%s1732_s9] ss:$0 sm:$0xff] }
 0x2af   : > { %1249 = vmatprep.mubr.msk.bf16.mxu1 %vm1418_vm1, %v1417_v0 }
 0x2b0   : > { %v818_v46 = vpop.permute.xlu0 %817 }
 0x2b1   : > { %v834_v48 = vsel %vm828_vm12, %v827_v47, %v818_v46 }
 0x2b6   : > { %1250 = vmatmul.mubr.msk.bf16.gmra.mxu1 %vm854_vm13, %v834_v48 }
 0x2f1   : > { %v1257_v42 = vpop.f32.mrf.mxu0 }
 0x2f3   : > { %v1041_v6 = vpop.f32.mrf.mxu0 }
 0x2f4   : > { %v1042_v47 = vadd.f32 %v1204_v35, %v1041_v6 }
 0x2f5   : > { %v1258_v45 = vpop.f32.mrf.mxu0 }
 0x366   : > { %v899_v49 = vpop.f32.mrf.mxu1 }
 0x367   : > { %v1044_v49 = vpop.f32.mrf.mxu0 }
 0x368   : > { %v1243_v50 = vpop.f32.mrf.mxu1 }
 0x36a   : > { %v901_v52 = vpop.f32.mrf.mxu1 }
 0x36b   : > { %v902_v53 = vadd.f32 %v1193_v51, %v901_v52  ;;  %v1045_v52 = vadd.f32 %v1204_v35, %v1044_v49 }
 0x36c   : > { %v1244_v56 = vpop.f32.mrf.mxu1 }
 0x36d   : > { %v920_v57 = vmul.f32 %v902_v53, %v902_v53 }
 0x36e   : > { %v906_v59 = vpop.f32.mrf.mxu1 }
 0x36f   : > { %v907_v0 = vadd.f32 %v1193_v51, %v906_v59  ;;  %v924_v60 = vsel %vm534_vm9, %v920_v57, 0.0 }
 0x370   : > { %925 = vadd.xlane.f32.xlu1 %v924_v60  ;;  %v1247_v54 = vpop.f32.mrf.mxu1  ;;  %v1050_v60 = vadd.f32 %v1257_v42, %v1204_v35 }
 0x371   : > { %v921_v61 = vmul.f32 %v907_v0, %v907_v0 }
 0x372   : > { %v909_v62 = vpop.f32.mrf.mxu1 }
 0x373   : > { %v910_v63 = vadd.f32 %v1193_v51, %v909_v62  ;;  %v927_v1 = vsel %vm534_vm9, %v921_v61, 0.0 }
 0x374   : > { %928 = vadd.xlane.f32.xlu0 %v927_v1  ;;  %v1248_v2 = vpop.f32.mrf.mxu1 }
 0x375   : > { %v922_v3 = vmul.f32 %v910_v63, %v910_v63 }
 0x376   : > { %v914_v4 = vpop.f32.mrf.mxu1 }
 0x377   : > { %v915_v8 = vadd.f32 %v1193_v51, %v914_v4  ;;  %v930_v9 = vsel %vm534_vm9, %v922_v3, 0.0 }
 0x378   : > { %931 = vadd.xlane.f32.xlu0 %v930_v9  ;;  %v1251_v10 = vpop.f32.mrf.mxu1 }
 0x379   : > { %v923_v55 = vmul.f32 %v915_v8, %v915_v8 }
 0x37a   : > { %v917_v11 = vpop.f32.mrf.mxu1 }
 0x37b   : > { %v933_v5 = vsel %vm534_vm9, %v923_v55, 0.0 }
 0x37c   : > { %934 = vadd.xlane.f32.xlu1 %v933_v5  ;;  %v1252_v12 = vpop.f32.mrf.mxu1 }
 0x3f9   : > { %v926_v15 = vpop.xlane.xlu1 %925 }
 0x3fa   : > { %v936_v16 = vmax.f32 %v926_v15, 1e-24 }
 0x3fc   : > { %1353 = vrsqrt.f32 %v936_v16 }
 0x3fd   : > { %v929_v17 = vpop.xlane.xlu0 %928 }
 0x3fe   : > { %v937_v14 = vmax.f32 %v929_v17, 1e-24 }
 0x400   : > { %1355 = vrsqrt.f32 %v937_v14 }
 0x401   : > { %v932_v18 = vpop.xlane.xlu0 %931 }
 0x402   : > { %v938_v19 = vmax.f32 %v932_v18, 1e-24 }
 0x404   : > { %1357 = vrsqrt.f32 %v938_v19 }
 0x405   : > { %v935_v20 = vpop.xlane.xlu1 %934 }
 0x406   : > { %v939_v22 = vmax.f32 %v935_v20, 1e-24 }
 0x408   : > { %1359 = vrsqrt.f32 %v939_v22 }
 0x409   : > { %v1354_v23 = vpop.eup %1353 }
 0x40a   : > { %v944_v28 = vmul.f32 %v1354_v23, %v902_v53 }
 0x40c   : > { %v955_v25 = vmul.f32 %v1199_v24, %v944_v28 }
 0x40d   : > { %v1356_v26 = vpop.eup %1355 }
 0x40e   : > { %v1200_v29 = vmul.f32 -1.442695, %v955_v25  ;;  %v945_v30 = vmul.f32 %v1356_v26, %v907_v0 }
 0x410   : > { %1361 = vpow2.f32 %v1200_v29  ;;  %v956_v31 = vmul.f32 %v1199_v24, %v945_v30 }
 0x411   : > { %v1358_v32 = vpop.eup %1357 }
 0x412   : > { %v946_v21 = vmul.f32 %v1358_v32, %v910_v63  ;;  %v1201_v27 = vmul.f32 -1.442695, %v956_v31  ;;  %v1053_v63 = vadd.f32 %v1258_v45, %v1204_v35 }
 0x414   : > { %v957_v58 = vmul.f32 %v1199_v24, %v946_v21  ;;  %1363 = vpow2.f32 %v1201_v27 }
 0x415   : > { %v1360_v33 = vpop.eup %1359 }
 0x416   : > { %v1202_v34 = vmul.f32 -1.442695, %v957_v58  ;;  %v947_v36 = vmul.f32 %v1360_v33, %v915_v8 }
 0x418   : > { %1365 = vpow2.f32 %v1202_v34  ;;  %v958_v37 = vmul.f32 %v1199_v24, %v947_v36 }
 0x41a   : > { %v1203_v38 = vmul.f32 -1.442695, %v958_v37 }
 0x41c   : > { %1367 = vpow2.f32 %v1203_v38 }
 0x41d   : > { %v1362_v39 = vpop.eup %1361 }
 0x41e   : > { %v971_v40 = vadd.f32 1.0, %v1362_v39 }
 0x420   : > { %1369 = vrcp.f32 %v971_v40 }
 0x421   : > { %v1364_v41 = vpop.eup %1363 }
 0x422   : > { %v972_v43 = vadd.f32 1.0, %v1364_v41 }
 0x424   : > { %1371 = vrcp.f32 %v972_v43 }
 0x425   : > { %v1366_v44 = vpop.eup %1365 }
 0x426   : > { %v973_v7 = vadd.f32 1.0, %v1366_v44 }
 0x428   : > { %1373 = vrcp.f32 %v973_v7 }
 0x429   : > { %v1368_v13 = vpop.eup %1367 }
 0x42a   : > { %v974_v46 = vadd.f32 1.0, %v1368_v13 }
 0x42c   : > { %1375 = vrcp.f32 %v974_v46 }
 0x42d   : > { %v1370_v48 = vpop.eup %1369 }
 0x42e   : > { %v983_v50 = vmul.f32 %v1370_v48, %v955_v25 }
 0x430   : > { %v1056_v51 = vadd.f32 %v1042_v47, %v983_v50 }
 0x431   : > { %v1372_v53 = vpop.eup %1371 }
 0x432   : > { %1060 = vst.msk [vmem:[%s409_s14] sm:$0xff] %vm534_vm9, %v1056_v51  ;;  %v984_v56 = vmul.f32 %v1372_v53, %v956_v31 }
 0x434   : > { %v1057_v57 = vadd.f32 %v1045_v52, %v984_v56 }
 0x435   : > { %v1374_v59 = vpop.eup %1373 }
 0x436   : > { %v985_v0 = vmul.f32 %v1374_v59, %v957_v58  ;;  %1061 = vst.msk [vmem:[%s409_s14 + $0x8] sm:$0xff] %vm534_vm9, %v1057_v57 }
 0x438   : > { %v1058_v54 = vadd.f32 %v1050_v60, %v985_v0 }
 0x439   : > { %v1376_v61 = vpop.eup %1375 }
 0x43a   : > { %1062 = vst.msk [vmem:[%s409_s14 + $0x10] sm:$0xff] %vm534_vm9, %v1058_v54  ;;  %v986_v62 = vmul.f32 %v1376_v61, %v958_v37 }
 0x43c   : > { %v1059_v1 = vadd.f32 %v1053_v63, %v986_v62 }
 0x43e   : > { %1063 = vst.msk [vmem:[%s409_s14 + $0x18] sm:$0xff] %vm534_vm9, %v1059_v1 }
 0x43f PF: > { %s20_s17 = sadd.s32 1, %s1415_s17   ;;  %s1738_s13 = smov %s1407_s15 }
 0x440   : > { %p17_p8 = scmp.ge.s32.totalorder %s20_s17, 6   ;;  %s1739_s14 = smov %s1411_s16 }
 0x441   : > { %s1740_s15 = smov %s1743_s18  ;;  %s1741_s16 = smov %s1747_s19 }
 0x442   :  { %19 = sbr.rel (!%p17_p8) target bundleno = 3 (0x3), region = 93 }

</bundles_post_ra>
